<compile_context>
chip_gen: v7x
topology: tpu7x:2x2x1
jax: 0.10.0
libtpu: 0.0.40
codegen_flags: <defaults>
</compile_context>

<pallas_src>
import jax
import jax.numpy as jnp
from jax.experimental import pallas as pl
from jax.experimental.pallas import tpu as pltpu


# Preferred tile sizes (rows x TILE_R x 128 f32 blocks).
_TILE_R_ROT3 = 512   # 3-row slab  -> 0.75 MiB per block
_TILE_R_AMBI = 256   # 16-row slab -> 2 MiB per block


# ---------------------------------------------------------------------------
# Pallas kernels
# ---------------------------------------------------------------------------
def _rot3_kernel(ang_ref, x_ref, o_ref):
    """3-D real-vector rotation.

    ang_ref: (6,) f32 SMEM = [cos a, sin a, cos b, sin b, cos g, sin g]
    x_ref / o_ref: (3, TILE_R, 128) VMEM; row 0/1/2 = X/Y/Z.
    """
    ca, sa = ang_ref[0], ang_ref[1]
    cb, sb = ang_ref[2], ang_ref[3]
    cg, sg = ang_ref[4], ang_ref[5]

    X = x_ref[0].astype(jnp.float32)
    Y = x_ref[1].astype(jnp.float32)
    Z = x_ref[2].astype(jnp.float32)

    # alpha: X, Y = X*cos(a) - Y*sin(a),  Y*cos(a) + X*sin(a)
    X1 = X * ca - Y * sa
    Y1 = Y * ca + X * sa
    # beta:  Z, X = Z*cos(b) - X*sin(-b), X*cos(b) + Z*sin(-b)
    Z2 = Z * cb + X1 * sb
    X2 = X1 * cb - Z * sb
    # gamma: X, Y = X*cos(g) - Y*sin(g),  Y*cos(g) + X*sin(g)
    X3 = X2 * cg - Y1 * sg
    Y3 = Y1 * cg + X2 * sg

    dt = o_ref.dtype
    o_ref[0] = X3.astype(dt)
    o_ref[1] = Y3.astype(dt)
    o_ref[2] = Z2.astype(dt)


def _ambi_rot_kernel(ang_ref, x_ref, o_ref):
    """First-order ambisonic rotation (Z(gamma) -> Wigner-d(beta) -> Z(alpha)).

    ang_ref: (10,) f32 SMEM = [ca, sa, cb, sb, cg, sg, dpp, dp0, dpm, d00]
    x_ref / o_ref: (16, TILE_R, 128) VMEM; rows 2c / 2c+1 = (re, im) of channel c.
    """
    ca, sa = ang_ref[0], ang_ref[1]
    cg, sg = ang_ref[4], ang_ref[5]
    dpp, dp0 = ang_ref[6], ang_ref[7]
    dpm, d00 = ang_ref[8], ang_ref[9]
    dt = o_ref.dtype

    # Channels 0 and 1 pass through unchanged (rows 0..3).
    for r in range(4):
        o_ref[r] = x_ref[r]

    # Each l-group (channels l-1, l, l+1) is independent -> process group-wise
    # to keep live vregs low.
    for l in (3, 6):
        base = 2 * (l - 1)
        rm = x_ref[base + 0].astype(jnp.float32)   # channel l-1 (m = -1)
        imm = x_ref[base + 1].astype(jnp.float32)
        r0 = x_ref[base + 2].astype(jnp.float32)   # channel l   (m =  0)
        im0 = x_ref[base + 3].astype(jnp.float32)
        rp = x_ref[base + 4].astype(jnp.float32)   # channel l+1 (m = +1)
        imp = x_ref[base + 5].astype(jnp.float32)

        # Z-rotation by gamma:  re' = re*cos(g*m) + im*sin(g*m)
        #                       im' = im*cos(g*m) - re*sin(g*m)
        rm1 = rm * cg - imm * sg          # m = -1
        imm1 = imm * cg + rm * sg
        rp1 = rp * cg + imp * sg          # m = +1
        imp1 = imp * cg - rp * sg
        # m = 0: (r0, im0) unchanged.

        # Wigner small-d (l = 1) with beta.
        rm2 = rm1 * dpp - r0 * dp0 + rp1 * dpm
        imm2 = imm1 * dpp - im0 * dp0 + imp1 * dpm
        r02 = rm1 * dp0 + r0 * d00 - rp1 * dp0
        im02 = imm1 * dp0 + im0 * d00 - imp1 * dp0
        rp2 = rm1 * dpm + r0 * dp0 + rp1 * dpp
        imp2 = imm1 * dpm + im0 * dp0 + imp1 * dpp

        # Z-rotation by alpha.
        rm3 = rm2 * ca - imm2 * sa
        imm3 = imm2 * ca + rm2 * sa
        rp3 = rp2 * ca + imp2 * sa
        imp3 = imp2 * ca - rp2 * sa

        o_ref[base + 0] = rm3.astype(dt)
        o_ref[base + 1] = imm3.astype(dt)
        o_ref[base + 2] = r02.astype(dt)
        o_ref[base + 3] = im02.astype(dt)
        o_ref[base + 4] = rp3.astype(dt)
        o_ref[base + 5] = imp3.astype(dt)


# ---------------------------------------------------------------------------
# Wrapper (layout plumbing: angle prep, reshapes, padding, pallas_call)
# ---------------------------------------------------------------------------
def _round_up(a, b):
    return ((a + b - 1) // b) * b


def _pick_tile_r(n, preferred):
    """Tile rows (in lane-groups of 128); multiple of 16 (covers f32 & bf16)."""
    n_lanes = _round_up(max(n, 1), 128) // 128
    return min(preferred, _round_up(n_lanes, 16))


def _run_slab(kernel, ang, slab, rows, n, preferred_tile_r):
    """Run `kernel` over a (rows, n) slab via a (rows, N/128, 128) tiled grid."""
    tile_r = _pick_tile_r(n, preferred_tile_r)
    n_pad = _round_up(n, tile_r * 128)
    if n_pad != n:
        slab = jnp.pad(slab, ((0, 0), (0, n_pad - n)))
    lanes = n_pad // 128
    slab3 = slab.reshape(rows, lanes, 128)

    out = pl.pallas_call(
        kernel,
        out_shape=jax.ShapeDtypeStruct((rows, lanes, 128), slab.dtype),
        grid=(lanes // tile_r,),
        in_specs=[
            pl.BlockSpec(memory_space=pltpu.MemorySpace.SMEM),          # angles
            pl.BlockSpec((rows, tile_r, 128), lambda i: (0, i, 0)),     # slab
        ],
        out_specs=pl.BlockSpec((rows, tile_r, 128), lambda i: (0, i, 0)),
        compiler_params=pltpu.CompilerParams(
            dimension_semantics=("parallel",)),
    )(ang, slab3)
    return out.reshape(rows, n_pad)[:, :n]


def _forward(x, alpha, beta, gamma):
    alpha = jnp.asarray(alpha, jnp.float32)
    beta = jnp.asarray(beta, jnp.float32)
    gamma = jnp.asarray(gamma, jnp.float32)
    ca, sa = jnp.cos(alpha), jnp.sin(alpha)
    cb, sb = jnp.cos(beta), jnp.sin(beta)
    cg, sg = jnp.cos(gamma), jnp.sin(gamma)

    # Keep bf16 traffic as bf16 (halves HBM bytes); anything else -> f32.
    if x.dtype not in (jnp.dtype(jnp.float32), jnp.dtype(jnp.bfloat16)):
        x = x.astype(jnp.float32)

    if x.ndim == 4:
        assert x.shape[-1] == 3
        B, C, T, _ = x.shape
        n = B * C * T
        # (B,C,T,3) -> (3, N).  The trailing size-3 xyz axis can't be made
        # lane-dense by reshape alone; the transpose is left to XLA and fuses
        # with cast/pad/reshape under jit.
        slab = x.reshape(n, 3).T
        ang = jnp.stack([ca, sa, cb, sb, cg, sg]).astype(jnp.float32)
        out = _run_slab(_rot3_kernel, ang, slab, 3, n, _TILE_R_ROT3)
        return out.T.reshape(B, C, T, 3)

    if x.ndim == 5:
        B, CH, T, F, R = x.shape
        assert CH == 8 and R == 2
        n = B * T * F
        # (B,8,T,F,2) -> (8,2,B,T,F) -> (16, N): rows 2c / 2c+1 = (re, im) of ch c.
        slab = jnp.transpose(x, (1, 4, 0, 2, 3)).reshape(16, n)
        # Precompute Wigner-d (l=1) scalars here so the kernel does no scalar math.
        dpp = (1.0 + cb) / 2.0
        dp0 = -sb / 1.4142136          # matches the torch module's constant
        dpm = (1.0 - cb) / 2.0
        d00 = cb
        ang = jnp.stack(
            [ca, sa, cb, sb, cg, sg, dpp, dp0, dpm, d00]).astype(jnp.float32)
        out = _run_slab(_ambi_rot_kernel, ang, slab, 16, n, _TILE_R_AMBI)
        return jnp.transpose(out.reshape(8, 2, B, T, F), (2, 0, 3, 4, 1))

    raise ValueError("expected 4-D (B,C,T,3) or 5-D (B,8,T,F,2) input")


# One jit over the whole path so the layout transposes fuse with cast/pad.
adversarial_rotation_1d = jax.jit(_forward)


# ---------------------------------------------------------------------------
# Pure-JAX reference (mirrors the PyTorch forward exactly) for validation
# ---------------------------------------------------------------------------
def _reference(x, alpha, beta, gamma):
    x = x.astype(jnp.float32)
    if x.ndim == 4:
        X, Y, Z = x[..., 0], x[..., 1], x[..., 2]
        X, Y = (X * jnp.cos(alpha) - Y * jnp.sin(alpha),
                Y * jnp.cos(alpha) + X * jnp.sin(alpha))
        Z, X = (Z * jnp.cos(beta) - X * jnp.sin(-beta),
                X * jnp.cos(beta) + Z * jnp.sin(-beta))
        X, Y = (X * jnp.cos(gamma) - Y * jnp.sin(gamma),
                Y * jnp.cos(gamma) + X * jnp.sin(gamma))
        return jnp.stack([X, Y, Z], -1)

    def zstep(x, ang):
        ret = [x[:, 0], x[:, 1]]
        for l in (3, 6):
            for m in (-1, 0, 1):
                re = (x[:, l + m, :, :, 0] * jnp.cos(ang * m)
                      + x[:, l + m, :, :, 1] * jnp.sin(ang * m))
                im = (x[:, l + m, :, :, 1] * jnp.cos(ang * m)
                      - x[:, l + m, :, :, 0] * jnp.sin(ang * m))
                ret.append(jnp.stack([re, im], -1))
        return jnp.stack(ret, axis=1)

    x = zstep(x, gamma)
    ret = [x[:, 0], x[:, 1]]
    for l in (3, 6):
        dpp = (1.0 + jnp.cos(beta)) / 2.0
        dp0 = -jnp.sin(beta) / 1.4142136
        dpm = (1.0 - jnp.cos(beta)) / 2.0
        d00 = jnp.cos(beta)
        ret.append(x[:, l - 1] * dpp - x[:, l] * dp0 + x[:, l + 1] * dpm)
        ret.append(x[:, l - 1] * dp0 + x[:, l] * d00 - x[:, l + 1] * dp0)
        ret.append(x[:, l - 1] * dpm + x[:, l] * dp0 + x[:, l + 1] * dpp)
    x = jnp.stack(ret, axis=1)
    x = zstep(x, alpha)
    return x


if __name__ == "__main__":
    key = jax.random.PRNGKey(0)
    k1, k2, k3, k4 = jax.random.split(key, 4)

    # Module's __init__ sets alpha=beta=gamma=0.0 (identity). Use deterministic
    # nonzero values so the rotation math is actually exercised.
    alpha = jnp.float32(0.3)
    beta = jnp.float32(-0.2)
    gamma = jnp.float32(0.5)

    # --- small shapes (single-tile path) ---
    x4 = jax.random.normal(k1, (2, 4, 16, 3), dtype=jnp.float32)
    y4 = jax.block_until_ready(adversarial_rotation_1d(x4, alpha, beta, gamma))
    r4 = _reference(x4, alpha, beta, gamma)
    assert y4.shape == x4.shape and y4.dtype == jnp.float32
    assert jnp.allclose(y4, r4, atol=1e-5, rtol=1e-5)

    x5 = jax.random.normal(k2, (2, 8, 8, 16, 2), dtype=jnp.float32)
    y5 = jax.block_until_ready(adversarial_rotation_1d(x5, alpha, beta, gamma))
    r5 = _reference(x5, alpha, beta, gamma)
    assert y5.shape == x5.shape and y5.dtype == jnp.float32
    assert jnp.allclose(y5, r5, atol=1e-5, rtol=1e-5)

    # --- medium shapes (multi-tile grid + lane-padding path) ---
    x4b = jax.random.normal(k3, (2, 4, 12000, 3), dtype=jnp.float32)
    y4b = jax.block_until_ready(adversarial_rotation_1d(x4b, alpha, beta, gamma))
    assert jnp.allclose(y4b, _reference(x4b, alpha, beta, gamma),
                        atol=1e-4, rtol=1e-4)

    x5b = jax.random.normal(k4, (2, 8, 120, 160, 2), dtype=jnp.float32)
    y5b = jax.block_until_ready(adversarial_rotation_1d(x5b, alpha, beta, gamma))
    assert jnp.allclose(y5b, _reference(x5b, alpha, beta, gamma),
                        atol=1e-4, rtol=1e-4)

    print("KERNEL_OK")
</pallas_src>

<mosaic_0001>
module attributes {stable_mosaic.version = 11 : i64} {
  func.func @_rot3_kernel(%arg0: i32, %arg1: memref<6xf32, #tpu.memory_space<smem>>, %arg2: memref<3x16x128xf32, #tpu.memory_space<vmem>>, %arg3: memref<3x16x128xf32, #tpu.memory_space<vmem>>) attributes {dimension_semantics = [#tpu.dimension_semantics<parallel>], iteration_bounds = array<i64: 1>, scalar_prefetch = 0 : i64, scratch_operands = 0 : i64, tpu.core_type = #tpu.core_type<tc>, window_params = [{transform_indices = @transform_0, window_bounds = array<i64: 6>}, {transform_indices = @transform_1, window_bounds = array<i64: 3, 16, 128>}, {transform_indices = @transform_2, window_bounds = array<i64: 3, 16, 128>}]} {
    %c0 = arith.constant 0 : index
    %0 = memref.load %arg1[%c0] : memref<6xf32, #tpu.memory_space<smem>>
    %c1 = arith.constant 1 : index
    %1 = memref.load %arg1[%c1] : memref<6xf32, #tpu.memory_space<smem>>
    %c2 = arith.constant 2 : index
    %2 = memref.load %arg1[%c2] : memref<6xf32, #tpu.memory_space<smem>>
    %c3 = arith.constant 3 : index
    %3 = memref.load %arg1[%c3] : memref<6xf32, #tpu.memory_space<smem>>
    %c4 = arith.constant 4 : index
    %4 = memref.load %arg1[%c4] : memref<6xf32, #tpu.memory_space<smem>>
    %c5 = arith.constant 5 : index
    %5 = memref.load %arg1[%c5] : memref<6xf32, #tpu.memory_space<smem>>
    %c0_0 = arith.constant 0 : index
    %c0_1 = arith.constant 0 : index
    %c0_2 = arith.constant 0 : index
    %6 = vector.load %arg2[%c0_0, %c0_1, %c0_2] : memref<3x16x128xf32, #tpu.memory_space<vmem>>, vector<1x16x128xf32>
    %7 = vector.shape_cast %6 : vector<1x16x128xf32> to vector<16x128xf32>
    %c1_3 = arith.constant 1 : index
    %c0_4 = arith.constant 0 : index
    %c0_5 = arith.constant 0 : index
    %8 = vector.load %arg2[%c1_3, %c0_4, %c0_5] : memref<3x16x128xf32, #tpu.memory_space<vmem>>, vector<1x16x128xf32>
    %9 = vector.shape_cast %8 : vector<1x16x128xf32> to vector<16x128xf32>
    %c2_6 = arith.constant 2 : index
    %c0_7 = arith.constant 0 : index
    %c0_8 = arith.constant 0 : index
    %10 = vector.load %arg2[%c2_6, %c0_7, %c0_8] : memref<3x16x128xf32, #tpu.memory_space<vmem>>, vector<1x16x128xf32>
    %11 = vector.shape_cast %10 : vector<1x16x128xf32> to vector<16x128xf32>
    %12 = vector.broadcast %0 : f32 to vector<16x128xf32>
    %13 = arith.mulf %7, %12 : vector<16x128xf32>
    %14 = vector.broadcast %1 : f32 to vector<16x128xf32>
    %15 = arith.mulf %9, %14 : vector<16x128xf32>
    %16 = arith.subf %13, %15 : vector<16x128xf32>
    %17 = vector.broadcast %0 : f32 to vector<16x128xf32>
    %18 = arith.mulf %9, %17 : vector<16x128xf32>
    %19 = vector.broadcast %1 : f32 to vector<16x128xf32>
    %20 = arith.mulf %7, %19 : vector<16x128xf32>
    %21 = arith.addf %18, %20 : vector<16x128xf32>
    %22 = vector.broadcast %2 : f32 to vector<16x128xf32>
    %23 = arith.mulf %11, %22 : vector<16x128xf32>
    %24 = vector.broadcast %3 : f32 to vector<16x128xf32>
    %25 = arith.mulf %16, %24 : vector<16x128xf32>
    %26 = arith.addf %23, %25 : vector<16x128xf32>
    %27 = vector.broadcast %2 : f32 to vector<16x128xf32>
    %28 = arith.mulf %16, %27 : vector<16x128xf32>
    %29 = vector.broadcast %3 : f32 to vector<16x128xf32>
    %30 = arith.mulf %11, %29 : vector<16x128xf32>
    %31 = arith.subf %28, %30 : vector<16x128xf32>
    %32 = vector.broadcast %4 : f32 to vector<16x128xf32>
    %33 = arith.mulf %31, %32 : vector<16x128xf32>
    %34 = vector.broadcast %5 : f32 to vector<16x128xf32>
    %35 = arith.mulf %21, %34 : vector<16x128xf32>
    %36 = arith.subf %33, %35 : vector<16x128xf32>
    %37 = vector.broadcast %4 : f32 to vector<16x128xf32>
    %38 = arith.mulf %21, %37 : vector<16x128xf32>
    %39 = vector.broadcast %5 : f32 to vector<16x128xf32>
    %40 = arith.mulf %31, %39 : vector<16x128xf32>
    %41 = arith.addf %38, %40 : vector<16x128xf32>
    %c0_9 = arith.constant 0 : index
    %c0_10 = arith.constant 0 : index
    %c0_11 = arith.constant 0 : index
    %42 = vector.load %arg3[%c0_9, %c0_10, %c0_11] : memref<3x16x128xf32, #tpu.memory_space<vmem>>, vector<1x16x128xf32>
    %43 = vector.shape_cast %42 : vector<1x16x128xf32> to vector<16x128xf32>
    %44 = vector.shape_cast %36 : vector<16x128xf32> to vector<1x16x128xf32>
    tpu.vector_store %arg3[%c0_9, %c0_10, %c0_11], %44 {strides = array<i32>} : memref<3x16x128xf32, #tpu.memory_space<vmem>>, vector<1x16x128xf32>,
    %c1_12 = arith.constant 1 : index
    %c0_13 = arith.constant 0 : index
    %c0_14 = arith.constant 0 : index
    %45 = vector.load %arg3[%c1_12, %c0_13, %c0_14] : memref<3x16x128xf32, #tpu.memory_space<vmem>>, vector<1x16x128xf32>
    %46 = vector.shape_cast %45 : vector<1x16x128xf32> to vector<16x128xf32>
    %47 = vector.shape_cast %41 : vector<16x128xf32> to vector<1x16x128xf32>
    tpu.vector_store %arg3[%c1_12, %c0_13, %c0_14], %47 {strides = array<i32>} : memref<3x16x128xf32, #tpu.memory_space<vmem>>, vector<1x16x128xf32>,
    %c2_15 = arith.constant 2 : index
    %c0_16 = arith.constant 0 : index
    %c0_17 = arith.constant 0 : index
    %48 = vector.load %arg3[%c2_15, %c0_16, %c0_17] : memref<3x16x128xf32, #tpu.memory_space<vmem>>, vector<1x16x128xf32>
    %49 = vector.shape_cast %48 : vector<1x16x128xf32> to vector<16x128xf32>
    %50 = vector.shape_cast %26 : vector<16x128xf32> to vector<1x16x128xf32>
    tpu.vector_store %arg3[%c2_15, %c0_16, %c0_17], %50 {strides = array<i32>} : memref<3x16x128xf32, #tpu.memory_space<vmem>>, vector<1x16x128xf32>,
    return
  }
  func.func @transform_0(%arg0: i32) -> i32 {
    %c0_i32 = arith.constant 0 : i32
    %c0_i32_0 = arith.constant 0 : i32
    return %c0_i32 : i32
  }
  func.func @transform_1(%arg0: i32) -> (i32, i32, i32) {
    %c0_i32 = arith.constant 0 : i32
    %c0_i32_0 = arith.constant 0 : i32
    %c0_i32_1 = arith.constant 0 : i32
    return %c0_i32, %arg0, %c0_i32_0 : i32, i32, i32
  }
  func.func @transform_2(%arg0: i32) -> (i32, i32, i32) {
    %c0_i32 = arith.constant 0 : i32
    %c0_i32_0 = arith.constant 0 : i32
    %c0_i32_1 = arith.constant 0 : i32
    return %c0_i32, %arg0, %c0_i32_0 : i32, i32, i32
  }
}

</mosaic_0001>

<bundles_post_ra>
// kernel: _forward.1
= control target key start
LH: loop header
LB: loop body
LE: loop exit
PB: predicated region body
PF: predicated region fallthrough
CT: control target
= control target key end

     0   :  { %7 = vsyncpa [#allocation3], 0  ;;  %s176_s0 = inlined_call_operand.vmem [shape: f32[6], index: 0, kind: input, shape index: {}]   ;;  %s177_s1 = inlined_call_operand.vmem [shape: f32[3,16,128], index: 1, kind: input, shape index: {}]   ;;  %s178_s2 = inlined_call_operand.vmem [shape: f32[3,16,128], index: 2, kind: output, shape index: {}]  }
   0x1   :  { %s14_s11 = sshll.u32 %s176_s0, 4  ;;  %s15_s11 = int_to_ptr.vmem [resolvable:$true] %s14_s11 }
   0x2   :  { %s107_s12 = scalar_lea.vmem %s15_s11, 16  ;;  %p112_p1 = scmp.lt.s32.totalorder %s15_s11, %s15_s11 }
   0x3   :  { %p108_p0 = scmp.ne.s32.totalorder %s15_s11, %s107_s12  ;;  %p113_p2 = scmp.lt.s32.totalorder %s107_s12, %s107_s12 }
   0x5   :  { %p114_p3 = por %p113_p2, %p112_p1 }
   0x7   :  { %p115_p4 = pnand %p114_p3, %p108_p0 }
   0x9   :  { %118 = shalt.err (!%p115_p4)
}
   0xa   :  { %s121_s13 = smov [#allocation2]  }
   0xb   :  { %17 = dma.vmem_to_smem %s15_s11, 16, %s121_s13, [#allocation3]  }
   0xc   :  { %119 = dma.done.wait [#allocation3], 16  }
   0xd   :  { %120 = vsyncadd [#allocation3], 4294967280 }
   0xe   :  { %23 = sfence }
   0xf   :  { %s24_s14 = sld [smem:[#allocation2]]  ;;  %s93_s15 = sld [smem:[#allocation2 + $0x1]]  ;;  %v30_v0 = vld [vmem:[%s177_s1] sm:$0xff]  ;;  %v98_v1 = vld [vmem:[%s177_s1 + $0x10] sm:$0xff]  ;;  %v31_v5 = vld [vmem:[%s177_s1 + $0x8] sm:$0xff] }
  0x10   :  { %s94_s16 = sld [smem:[#allocation2 + $0x2]]  ;;  %s95_s17 = sld [smem:[#allocation2 + $0x3]]  ;;  %v100_v2 = vld [vmem:[%s177_s1 + $0x20] sm:$0xff]  ;;  %v99_v10 = vld [vmem:[%s177_s1 + $0x18] sm:$0xff]  ;;  %v101_v17 = vld [vmem:[%s177_s1 + $0x28] sm:$0xff] }
  0x11   :  { %s96_s18 = sld [smem:[#allocation2 + $0x4]]  ;;  %s97_s19 = sld [smem:[#allocation2 + $0x5]] }
  0x15   :  { %v38_v3 = vstv %s24_s14  ;;  %v41_v4 = vstv %s93_s15 }
  0x16   :  { %v39_v6 = vmul.f32 %v38_v3, %v30_v0  ;;  %v42_v7 = vmul.f32 %v98_v1, %v41_v4  ;;  %v46_v8 = vmul.f32 %v98_v1, %v38_v3  ;;  %v48_v9 = vmul.f32 %v41_v4, %v30_v0 }
  0x17   :  { %v52_v11 = vstv %s94_s16  ;;  %v55_v12 = vstv %s95_s17  ;;  %v66_v13 = vstv %s96_s18  ;;  %v40_v18 = vmul.f32 %v38_v3, %v31_v5 }
  0x18   :  { %v44_v14 = vsub.f32 %v39_v6, %v42_v7  ;;  %v50_v15 = vadd.f32 %v48_v9, %v46_v8  ;;  %v62_v16 = vmul.f32 %v100_v2, %v55_v12  ;;  %v69_v19 = vstv %s97_s19 }
  0x19   :  { %v43_v20 = vmul.f32 %v99_v10, %v41_v4  ;;  %v47_v21 = vmul.f32 %v99_v10, %v38_v3  ;;  %v49_v22 = vmul.f32 %v41_v4, %v31_v5  ;;  %v53_v24 = vmul.f32 %v100_v2, %v52_v11 }
  0x1a   :  { %v60_v23 = vmul.f32 %v52_v11, %v44_v14  ;;  %v63_v27 = vmul.f32 %v101_v17, %v55_v12  ;;  %v56_v28 = vmul.f32 %v55_v12, %v44_v14  ;;  %v70_v30 = vmul.f32 %v69_v19, %v50_v15 }
  0x1b   :  { %v45_v25 = vsub.f32 %v40_v18, %v43_v20  ;;  %v51_v26 = vadd.f32 %v49_v22, %v47_v21  ;;  %v74_v31 = vmul.f32 %v66_v13, %v50_v15  ;;  %v54_v32 = vmul.f32 %v101_v17, %v52_v11 }
  0x1c   :  { %v64_v29 = vsub.f32 %v60_v23, %v62_v16  ;;  %v58_v34 = vadd.f32 %v56_v28, %v53_v24 }
  0x1d   :  { %v61_v33 = vmul.f32 %v52_v11, %v45_v25  ;;  %v57_v37 = vmul.f32 %v55_v12, %v45_v25  ;;  %v71_v39 = vmul.f32 %v69_v19, %v51_v26  ;;  %v75_v40 = vmul.f32 %v66_v13, %v51_v26 }
  0x1e   :  { %v67_v35 = vmul.f32 %v66_v13, %v64_v29  ;;  %v76_v36 = vmul.f32 %v69_v19, %v64_v29  ;;  %104 = vst [vmem:[%s178_s2 + $0x20] sm:$0xff] %v58_v34 }
  0x1f   :  { %v65_v38 = vsub.f32 %v61_v33, %v63_v27  ;;  %v59_v43 = vadd.f32 %v57_v37, %v54_v32 }
  0x20   :  { %v72_v41 = vsub.f32 %v67_v35, %v70_v30  ;;  %v78_v42 = vadd.f32 %v76_v36, %v74_v31 }
  0x21   :  { %v68_v44 = vmul.f32 %v66_v13, %v65_v38  ;;  %v77_v45 = vmul.f32 %v69_v19, %v65_v38  ;;  %105 = vst [vmem:[%s178_s2 + $0x28] sm:$0xff] %v59_v43 }
  0x22   :  { %80 = vst [vmem:[%s178_s2] sm:$0xff] %v72_v41  ;;  %102 = vst [vmem:[%s178_s2 + $0x10] sm:$0xff] %v78_v42 }
  0x23   :  { %v73_v46 = vsub.f32 %v68_v44, %v71_v39  ;;  %v79_v47 = vadd.f32 %v77_v45, %v75_v40 }
  0x25   :  { %81 = vst [vmem:[%s178_s2 + $0x8] sm:$0xff] %v73_v46  ;;  %103 = vst [vmem:[%s178_s2 + $0x18] sm:$0xff] %v79_v47 }
  0x26   :  { %92 = vsyncpa [#allocation3], 1 }

</bundles_post_ra>
